<compile_context>
chip_gen: v5e
topology: v5e:2x2
jax: 0.10.0
libtpu: 0.0.40
codegen_flags: <defaults>
</compile_context>

<pallas_src>
import numpy as np

import jax
import jax.numpy as jnp
from jax.experimental import pallas as pl
from jax.experimental.pallas import tpu as pltpu


# ---------------------------------------------------------------------------
# Model configuration (small, synthetic)
# ---------------------------------------------------------------------------
D_IN = 3                  # xyz query points
D_OUT = 1                 # SDF value
HIDDEN = [32, 32, 32]     # dims argument of ImplicitNet
SKIP_IN = (2,)            # skip connection feeds `input` back in at layer 2
BETA = 100.0              # Softplus beta
RADIUS_INIT = 1.0
N_POINTS = 256            # number of query points
TILE_N = 256              # points per grid step (multiple of 128 lanes)


def _round_up(v, m):
    return ((v + m - 1) // m) * m


def build_layer_dims(d_in, d_out, dims, skip_in):
    """Replicates the (in_dim, out_dim) bookkeeping of ImplicitNet.__init__."""
    full = [d_in] + list(dims) + [d_out]
    num_layers = len(full)
    layer_dims = []
    for layer in range(num_layers - 1):
        if layer + 1 in skip_in:
            out_dim = full[layer + 1] - d_in
        else:
            out_dim = full[layer + 1]
        layer_dims.append((full[layer], out_dim))
    return layer_dims


def init_params(key, layer_dims, d_in, radius_init):
    """Geometric init, matching ImplicitNet.__init__ (geometric_init=True).

    Weights are stored as (in_dim, out_dim), biases as (1, out_dim), so the
    pure-JAX reference computes y = x @ W + b (same math as torch's Linear).
    """
    params = []
    num_lin = len(layer_dims)
    for layer, (in_dim, out_dim) in enumerate(layer_dims):
        key, wk = jax.random.split(key)
        if layer == num_lin - 1:
            mean = np.sqrt(np.pi) / np.sqrt(in_dim)
            w = mean + 1e-5 * jax.random.normal(wk, (in_dim, out_dim), jnp.float32)
            b = jnp.full((1, out_dim), -radius_init, jnp.float32)
        else:
            std = np.sqrt(2.0) / np.sqrt(out_dim)
            w = std * jax.random.normal(wk, (in_dim, out_dim), jnp.float32)
            b = jnp.zeros((1, out_dim), jnp.float32)
        params.append((w, b))
    return params


# ---------------------------------------------------------------------------
# Host-side packing: transposed, zero-padded weight / bias slabs + a static
# per-layer "program" consumed by the kernel closure.
# ---------------------------------------------------------------------------
def pack_params(params, d_in, skip_in):
    num_lin = len(params)
    H = _round_up(max(max(w.shape[0], w.shape[1]) for w, _ in params), 8)
    d_in_pad = _round_up(d_in, 8)

    w_blocks = []   # each (H, H), layout [out, in], zero-padded
    b_blocks = []   # each (H, 1), zero-padded
    program = []    # per layer: (w_idx, skip_w_idx or None, out_dim)

    for layer, (w, b) in enumerate(params):
        w = np.asarray(w, np.float32)                 # (in_dim, out_dim)
        b = np.asarray(b, np.float32).reshape(-1)     # (out_dim,)
        in_dim, out_dim = w.shape
        wt = w.T                                      # (out_dim, in_dim)
        if layer in skip_in:
            # concat order in forward is [x, input]: rows 0:prev of W belong to
            # the previous activation, rows prev: to the raw input.
            prev = in_dim - d_in
            blk_h = np.zeros((H, H), np.float32)
            blk_h[:out_dim, :prev] = wt[:, :prev]     # zero cols kill padded rows
            blk_i = np.zeros((H, H), np.float32)
            blk_i[:out_dim, :d_in] = wt[:, prev:]
            w_idx = len(w_blocks); w_blocks.append(blk_h)
            s_idx = len(w_blocks); w_blocks.append(blk_i)
            program.append((w_idx, s_idx, out_dim))
        else:
            blk = np.zeros((H, H), np.float32)
            blk[:out_dim, :in_dim] = wt
            w_idx = len(w_blocks); w_blocks.append(blk)
            program.append((w_idx, None, out_dim))
        bb = np.zeros((H, 1), np.float32)
        bb[:out_dim, 0] = b
        b_blocks.append(bb)

    w_slab = jnp.asarray(np.stack(w_blocks))          # (num_w, H, H)
    b_slab = jnp.asarray(np.stack(b_blocks))          # (num_lin, H, 1)
    return w_slab, b_slab, program, H, d_in_pad


# ---------------------------------------------------------------------------
# Pallas kernel: full MLP for one lane-dense tile of points.
# Activations live as (H, TILE_N) slabs; correctness of padded rows is
# guaranteed by the zero-padded weight columns (padded activation rows always
# hit zero weight columns in the next layer).
# ---------------------------------------------------------------------------
def make_kernel(program, num_lin, beta, d_in_pad, d_out):

    def softplus(x):
        # Stable, branch-free softplus with beta (== PyTorch's Softplus up to
        # ~1e-11 past its linearization threshold).
        bx = beta * x
        return jnp.maximum(x, 0.0) + jnp.log1p(jnp.exp(-jnp.abs(bx))) / beta

    def kernel(x_ref, w_ref, b_ref, o_ref):
        xin = x_ref[...]                                   # (d_in_pad, TILE_N)
        h = xin
        for layer, (w_idx, s_idx, _out_dim) in enumerate(program):
            last = layer == num_lin - 1
            if layer == 0:
                w = w_ref[w_idx, :, :d_in_pad]             # (H, d_in_pad)
                y = jnp.dot(w, xin, preferred_element_type=jnp.float32)
            else:
                w = w_ref[w_idx]                           # (H, H)
                y = jnp.dot(w, h, preferred_element_type=jnp.float32)
            if s_idx is not None:                          # skip-connection branch
                ws = w_ref[s_idx, :, :d_in_pad]            # (H, d_in_pad)
                y = y + jnp.dot(ws, xin, preferred_element_type=jnp.float32)
            y = y + b_ref[layer]                           # (H,1) bcast over lanes
            if last:
                o_ref[...] = y[:d_out, :].astype(o_ref.dtype)
            else:
                h = softplus(y)

    return kernel


def implicit_net_forward(x, params, *, skip_in=SKIP_IN, beta=BETA,
                         tile_n=TILE_N):
    n, d_in = x.shape
    assert tile_n % 128 == 0, "point tile must be lane-aligned (multiple of 128)"
    num_lin = len(params)
    d_out = params[-1][0].shape[1]

    w_slab, b_slab, program, _H, d_in_pad = pack_params(params, d_in, skip_in)

    # Feature-major, lane-dense input: points on the lane axis.
    n_pad = _round_up(n, tile_n)
    x_t = jnp.zeros((d_in_pad, n_pad), jnp.float32).at[:d_in, :n].set(x.T)

    kernel = make_kernel(program, num_lin, beta, d_in_pad, d_out)

    grid = (n_pad // tile_n,)
    out_t = pl.pallas_call(
        kernel,
        out_shape=jax.ShapeDtypeStruct((d_out, n_pad), jnp.float32),
        grid=grid,
        in_specs=[
            pl.BlockSpec((d_in_pad, tile_n), lambda i: (0, i)),
            pl.BlockSpec(w_slab.shape, lambda i: (0, 0, 0)),   # resident slab
            pl.BlockSpec(b_slab.shape, lambda i: (0, 0, 0)),   # resident slab
        ],
        out_specs=pl.BlockSpec((d_out, tile_n), lambda i: (0, i)),
        compiler_params=pltpu.CompilerParams(
            dimension_semantics=("parallel",)),
    )(x_t, w_slab, b_slab)

    # Back to points-major (n, d_out), same as the PyTorch module.
    return out_t[:, :n].T


# ---------------------------------------------------------------------------
# Pure-JAX reference (mirrors the PyTorch forward, incl. Softplus threshold).
# ---------------------------------------------------------------------------
def _softplus_beta_ref(x, beta):
    bx = beta * x
    sp = jnp.log1p(jnp.exp(jnp.minimum(bx, 20.0))) / beta
    return jnp.where(bx > 20.0, x, sp)


def reference_forward(x, params, skip_in=SKIP_IN, beta=BETA):
    inp = x
    num_lin = len(params)
    h = inp
    for layer, (w, b) in enumerate(params):
        if layer in skip_in:
            h = jnp.concatenate([h, inp], axis=-1)
        h = h @ w + b
        if layer < num_lin - 1:
            h = _softplus_beta_ref(h, beta)
    return h


if __name__ == "__main__":
    key = jax.random.PRNGKey(0)
    key, xkey, pkey = jax.random.split(key, 3)

    layer_dims = build_layer_dims(D_IN, D_OUT, HIDDEN, SKIP_IN)
    params = init_params(pkey, layer_dims, D_IN, RADIUS_INIT)

    # Query points in [-1, 1]^3
    x = jax.random.uniform(xkey, (N_POINTS, D_IN), jnp.float32,
                           minval=-1.0, maxval=1.0)

    out = implicit_net_forward(x, params)
    out = jax.block_until_ready(out)

    ref = reference_forward(x, params)
    np.testing.assert_allclose(np.asarray(out), np.asarray(ref),
                               rtol=1e-5, atol=1e-5)

    print("KERNEL_OK")
</pallas_src>

<mosaic_0001>
module attributes {stable_mosaic.version = 11 : i64} {
  func.func @kernel(%arg0: i32, %arg1: memref<8x256xf32, #tpu.memory_space<vmem>>, %arg2: memref<5x32x32xf32, #tpu.memory_space<vmem>>, %arg3: memref<4x32x1xf32, #tpu.memory_space<vmem>>, %arg4: memref<1x256xf32, #tpu.memory_space<vmem>>) attributes {dimension_semantics = [#tpu.dimension_semantics<parallel>], iteration_bounds = array<i64: 1>, scalar_prefetch = 0 : i64, scratch_operands = 0 : i64, tpu.core_type = #tpu.core_type<tc>, window_params = [{transform_indices = @transform_0, window_bounds = array<i64: 8, 256>}, {pipeline_mode = #tpu.pipeline_mode<synchronous>, transform_indices = @transform_1, window_bounds = array<i64: 5, 32, 32>}, {pipeline_mode = #tpu.pipeline_mode<synchronous>, transform_indices = @transform_2, window_bounds = array<i64: 4, 32, 1>}, {transform_indices = @transform_3, window_bounds = array<i64: 1, 256>}]} {
    %c0 = arith.constant 0 : index
    %c0_0 = arith.constant 0 : index
    %0 = vector.load %arg1[%c0, %c0_0] : memref<8x256xf32, #tpu.memory_space<vmem>>, vector<8x256xf32>
    %c0_1 = arith.constant 0 : index
    %c0_2 = arith.constant 0 : index
    %c0_3 = arith.constant 0 : index
    %1 = vector.load %arg2[%c0_1, %c0_2, %c0_3] : memref<5x32x32xf32, #tpu.memory_space<vmem>>, vector<1x32x8xf32>
    %2 = vector.shape_cast %1 : vector<1x32x8xf32> to vector<32x8xf32>
    %cst = arith.constant dense<0.000000e+00> : vector<32x256xf32>
    %3 = tpu.matmul %2, %0, %cst {dimension_numbers = #tpu.dot_dimension_numbers<[1], [0], [0], [1], [0, 0, 1, 1], [], []>} : vector<32x8xf32>, vector<8x256xf32>, vector<32x256xf32> -> vector<32x256xf32>
    %c0_4 = arith.constant 0 : index
    %c0_5 = arith.constant 0 : index
    %c0_6 = arith.constant 0 : index
    %4 = vector.load %arg3[%c0_4, %c0_5, %c0_6] : memref<4x32x1xf32, #tpu.memory_space<vmem>>, vector<1x32x1xf32>
    %5 = vector.shape_cast %4 : vector<1x32x1xf32> to vector<32x1xf32>
    %6 = vector.broadcast %5 : vector<32x1xf32> to vector<32x256xf32>
    %7 = arith.addf %3, %6 : vector<32x256xf32>
    %cst_7 = arith.constant 1.000000e+02 : f32
    %8 = vector.broadcast %cst_7 : f32 to vector<32x256xf32>
    %9 = arith.mulf %8, %7 : vector<32x256xf32>
    %cst_8 = arith.constant 0.000000e+00 : f32
    %10 = vector.broadcast %cst_8 : f32 to vector<32x256xf32>
    %11 = arith.maximumf %7, %10 : vector<32x256xf32>
    %12 = math.absf %9 : vector<32x256xf32>
    %cst_9 = arith.constant 0.000000e+00 : f32
    %13 = vector.broadcast %cst_9 : f32 to vector<32x256xf32>
    %14 = arith.subf %13, %12 : vector<32x256xf32>
    %15 = math.exp %14 : vector<32x256xf32>
    %16 = math.log1p %15 : vector<32x256xf32>
    %cst_10 = arith.constant 1.000000e+02 : f32
    %17 = vector.broadcast %cst_10 : f32 to vector<32x256xf32>
    %18 = arith.divf %16, %17 : vector<32x256xf32>
    %19 = arith.addf %11, %18 : vector<32x256xf32>
    %c1 = arith.constant 1 : index
    %c0_11 = arith.constant 0 : index
    %c0_12 = arith.constant 0 : index
    %20 = vector.load %arg2[%c1, %c0_11, %c0_12] : memref<5x32x32xf32, #tpu.memory_space<vmem>>, vector<1x32x32xf32>
    %21 = vector.shape_cast %20 : vector<1x32x32xf32> to vector<32x32xf32>
    %cst_13 = arith.constant dense<0.000000e+00> : vector<32x256xf32>
    %22 = tpu.matmul %21, %19, %cst_13 {dimension_numbers = #tpu.dot_dimension_numbers<[1], [0], [0], [1], [0, 0, 1, 1], [], []>} : vector<32x32xf32>, vector<32x256xf32>, vector<32x256xf32> -> vector<32x256xf32>
    %c1_14 = arith.constant 1 : index
    %c0_15 = arith.constant 0 : index
    %c0_16 = arith.constant 0 : index
    %23 = vector.load %arg3[%c1_14, %c0_15, %c0_16] : memref<4x32x1xf32, #tpu.memory_space<vmem>>, vector<1x32x1xf32>
    %24 = vector.shape_cast %23 : vector<1x32x1xf32> to vector<32x1xf32>
    %25 = vector.broadcast %24 : vector<32x1xf32> to vector<32x256xf32>
    %26 = arith.addf %22, %25 : vector<32x256xf32>
    %cst_17 = arith.constant 1.000000e+02 : f32
    %27 = vector.broadcast %cst_17 : f32 to vector<32x256xf32>
    %28 = arith.mulf %27, %26 : vector<32x256xf32>
    %cst_18 = arith.constant 0.000000e+00 : f32
    %29 = vector.broadcast %cst_18 : f32 to vector<32x256xf32>
    %30 = arith.maximumf %26, %29 : vector<32x256xf32>
    %31 = math.absf %28 : vector<32x256xf32>
    %cst_19 = arith.constant 0.000000e+00 : f32
    %32 = vector.broadcast %cst_19 : f32 to vector<32x256xf32>
    %33 = arith.subf %32, %31 : vector<32x256xf32>
    %34 = math.exp %33 : vector<32x256xf32>
    %35 = math.log1p %34 : vector<32x256xf32>
    %cst_20 = arith.constant 1.000000e+02 : f32
    %36 = vector.broadcast %cst_20 : f32 to vector<32x256xf32>
    %37 = arith.divf %35, %36 : vector<32x256xf32>
    %38 = arith.addf %30, %37 : vector<32x256xf32>
    %c2 = arith.constant 2 : index
    %c0_21 = arith.constant 0 : index
    %c0_22 = arith.constant 0 : index
    %39 = vector.load %arg2[%c2, %c0_21, %c0_22] : memref<5x32x32xf32, #tpu.memory_space<vmem>>, vector<1x32x32xf32>
    %40 = vector.shape_cast %39 : vector<1x32x32xf32> to vector<32x32xf32>
    %cst_23 = arith.constant dense<0.000000e+00> : vector<32x256xf32>
    %41 = tpu.matmul %40, %38, %cst_23 {dimension_numbers = #tpu.dot_dimension_numbers<[1], [0], [0], [1], [0, 0, 1, 1], [], []>} : vector<32x32xf32>, vector<32x256xf32>, vector<32x256xf32> -> vector<32x256xf32>
    %c3 = arith.constant 3 : index
    %c0_24 = arith.constant 0 : index
    %c0_25 = arith.constant 0 : index
    %42 = vector.load %arg2[%c3, %c0_24, %c0_25] : memref<5x32x32xf32, #tpu.memory_space<vmem>>, vector<1x32x8xf32>
    %43 = vector.shape_cast %42 : vector<1x32x8xf32> to vector<32x8xf32>
    %cst_26 = arith.constant dense<0.000000e+00> : vector<32x256xf32>
    %44 = tpu.matmul %43, %0, %cst_26 {dimension_numbers = #tpu.dot_dimension_numbers<[1], [0], [0], [1], [0, 0, 1, 1], [], []>} : vector<32x8xf32>, vector<8x256xf32>, vector<32x256xf32> -> vector<32x256xf32>
    %45 = arith.addf %41, %44 : vector<32x256xf32>
    %c2_27 = arith.constant 2 : index
    %c0_28 = arith.constant 0 : index
    %c0_29 = arith.constant 0 : index
    %46 = vector.load %arg3[%c2_27, %c0_28, %c0_29] : memref<4x32x1xf32, #tpu.memory_space<vmem>>, vector<1x32x1xf32>
    %47 = vector.shape_cast %46 : vector<1x32x1xf32> to vector<32x1xf32>
    %48 = vector.broadcast %47 : vector<32x1xf32> to vector<32x256xf32>
    %49 = arith.addf %45, %48 : vector<32x256xf32>
    %cst_30 = arith.constant 1.000000e+02 : f32
    %50 = vector.broadcast %cst_30 : f32 to vector<32x256xf32>
    %51 = arith.mulf %50, %49 : vector<32x256xf32>
    %cst_31 = arith.constant 0.000000e+00 : f32
    %52 = vector.broadcast %cst_31 : f32 to vector<32x256xf32>
    %53 = arith.maximumf %49, %52 : vector<32x256xf32>
    %54 = math.absf %51 : vector<32x256xf32>
    %cst_32 = arith.constant 0.000000e+00 : f32
    %55 = vector.broadcast %cst_32 : f32 to vector<32x256xf32>
    %56 = arith.subf %55, %54 : vector<32x256xf32>
    %57 = math.exp %56 : vector<32x256xf32>
    %58 = math.log1p %57 : vector<32x256xf32>
    %cst_33 = arith.constant 1.000000e+02 : f32
    %59 = vector.broadcast %cst_33 : f32 to vector<32x256xf32>
    %60 = arith.divf %58, %59 : vector<32x256xf32>
    %61 = arith.addf %53, %60 : vector<32x256xf32>
    %c4 = arith.constant 4 : index
    %c0_34 = arith.constant 0 : index
    %c0_35 = arith.constant 0 : index
    %62 = vector.load %arg2[%c4, %c0_34, %c0_35] : memref<5x32x32xf32, #tpu.memory_space<vmem>>, vector<1x32x32xf32>
    %63 = vector.shape_cast %62 : vector<1x32x32xf32> to vector<32x32xf32>
    %cst_36 = arith.constant dense<0.000000e+00> : vector<32x256xf32>
    %64 = tpu.matmul %63, %61, %cst_36 {dimension_numbers = #tpu.dot_dimension_numbers<[1], [0], [0], [1], [0, 0, 1, 1], [], []>} : vector<32x32xf32>, vector<32x256xf32>, vector<32x256xf32> -> vector<32x256xf32>
    %c3_37 = arith.constant 3 : index
    %c0_38 = arith.constant 0 : index
    %c0_39 = arith.constant 0 : index
    %65 = vector.load %arg3[%c3_37, %c0_38, %c0_39] : memref<4x32x1xf32, #tpu.memory_space<vmem>>, vector<1x32x1xf32>
    %66 = vector.shape_cast %65 : vector<1x32x1xf32> to vector<32x1xf32>
    %67 = vector.broadcast %66 : vector<32x1xf32> to vector<32x256xf32>
    %68 = arith.addf %64, %67 : vector<32x256xf32>
    %69 = vector.extract_strided_slice %68 {offsets = [0, 0], sizes = [1, 256], strides = [1, 1]} : vector<32x256xf32> to vector<1x256xf32>
    %c0_40 = arith.constant 0 : index
    %c0_41 = arith.constant 0 : index
    %70 = vector.load %arg4[%c0_40, %c0_41] : memref<1x256xf32, #tpu.memory_space<vmem>>, vector<1x256xf32>
    tpu.vector_store %arg4[%c0_40, %c0_41], %69 {strides = array<i32>} : memref<1x256xf32, #tpu.memory_space<vmem>>, vector<1x256xf32>,
    return
  }
  func.func @transform_0(%arg0: i32) -> (i32, i32) {
    %c0_i32 = arith.constant 0 : i32
    %c0_i32_0 = arith.constant 0 : i32
    return %c0_i32, %arg0 : i32, i32
  }
  func.func @transform_1(%arg0: i32) -> (i32, i32, i32) {
    %c0_i32 = arith.constant 0 : i32
    %c0_i32_0 = arith.constant 0 : i32
    %c0_i32_1 = arith.constant 0 : i32
    %c0_i32_2 = arith.constant 0 : i32
    return %c0_i32, %c0_i32_0, %c0_i32_1 : i32, i32, i32
  }
  func.func @transform_2(%arg0: i32) -> (i32, i32, i32) {
    %c0_i32 = arith.constant 0 : i32
    %c0_i32_0 = arith.constant 0 : i32
    %c0_i32_1 = arith.constant 0 : i32
    %c0_i32_2 = arith.constant 0 : i32
    return %c0_i32, %c0_i32_0, %c0_i32_1 : i32, i32, i32
  }
  func.func @transform_3(%arg0: i32) -> (i32, i32) {
    %c0_i32 = arith.constant 0 : i32
    %c0_i32_0 = arith.constant 0 : i32
    return %c0_i32, %arg0 : i32, i32
  }
}

</mosaic_0001>

<bundles_post_ra>
// kernel: tpu_custom_call.1
= control target key start
LH: loop header
LB: loop body
LE: loop exit
PB: predicated region body
PF: predicated region fallthrough
CT: control target
= control target key end

     0   :  { %8 = vsyncpa [#allocation3], 0  ;;  %s1618_s0 = inlined_call_operand.vmem [shape: f32[8,256], index: 0, kind: input, shape index: {}]   ;;  %s1619_s1 = inlined_call_operand.hbm [shape: f32[5,32,32], index: 1, kind: input, shape index: {}]   ;;  %s1620_s2 = inlined_call_operand.vmem [shape: f32[4,32,1], index: 2, kind: input, shape index: {}]   ;;  %s1621_s3 = inlined_call_operand.hbm [shape: f32[1,256], index: 3, kind: output, shape index: {}]  }
   0x1   :  { %9 = vsyncpa [#allocation4], 0  ;;  %s16_s14 = sshll.u32 %s1619_s1, 4  ;;  %s1163_s15 = smov [#allocation2]   ;;  %s17_s14 = int_to_ptr.hbm [resolvable:$true] %s16_s14 }
   0x2   :  { %s18_s16 = sshll.u32 %s1163_s15, 4  ;;  %s1164_s17 = smov 128   ;;  %s19_s16 = int_to_ptr.vmem [resolvable:$true] %s18_s16 }
   0x3   :  { %s1165_s18 = smov 8  }
   0x4   :  { %24 = dma.hbm_to_vmem [thread:$0]  %s17_s14, 2560, %s19_s16, [#allocation3], %s1164_s17, %s1164_s17, %s1165_s18  }
   0x5   :  { %1159 = dma.done.wait [#allocation3], 2560  }
   0x6   :  { %1160 = vsyncadd [#allocation3], 4294964736  ;;  %v1166_v0 = vmov 0   ;;  %v40_v1 = vld [vmem:[%s1620_s2 + $0x18] sm:$0xff]  ;;  %v38_v2 = vld [vmem:[%s1620_s2 + $0x8] sm:$0xff]  ;;  %vm61_vm0 = vcmask 64512  }
   0x7   :  { %1011 = vset.pattern.permute.xlu1 %v1166_v0  ;;  %1010 = vset.pattern.permute.xlu0 %v1166_v0  ;;  %v31_v3 = vld [vmem:[%s1618_s0] sm:$0xff]  ;;  %v32_v4 = vld [vmem:[%s1618_s0 + $0x8] sm:$0xff]  ;;  %v35_v6 = vld [vmem:[#allocation2 + $0x10] sm:$0xff]  ;;  %v1167_v25 = vmov 100.0   ;;  %vm305_vm10 = vcmask 261120   ;;  %s940_s1 = sshll.u32 %s1621_s3, 4  ;;  %s941_s1 = int_to_ptr.hbm [resolvable:$true] %s940_s1 }
   0x8   :  { %1012 = vset.pattern.permute.xlu2 %v1166_v0  ;;  %58 = vperm.xlu0 %1010, %v40_v1   ;;  %v33_v5 = vld [vmem:[#allocation2] sm:$0xff]  ;;  %v39_v7 = vld [vmem:[%s1620_s2 + $0x10] sm:$0xff]  ;;  %v34_v9 = vld [vmem:[#allocation2 + $0x8] sm:$0xff]  ;;  %1013 = vrcp.f32 %v1167_v25 }
   0x9   :  { %48 = vperm.xlu1 %1011, %v38_v2   ;;  %89 = vmatpush.msra.mxu0 %v31_v3  ;;  %v37_v8 = vld [vmem:[%s1620_s2] sm:$0xff]  ;;  %v36_v10 = vld [vmem:[#allocation2 + $0x18] sm:$0xff]  ;;  %v959_v11 = vld [vmem:[%s1620_s2 + $0x28] sm:$0xff] }
   0xa   :  { %1002 = vmatpush.msra.mxu2 %v31_v3  ;;  %118 = vmatpush.msra.mxu1 %v32_v4  ;;  %v958_v12 = vld [vmem:[%s1620_s2 + $0x20] sm:$0xff]  ;;  %v988_v13 = vld [vmem:[%s1620_s2 + $0x50] sm:$0xff]  ;;  %v987_v14 = vld [vmem:[%s1620_s2 + $0x48] sm:$0xff] }
   0xb   :  { %1003 = vmatpush.msra.mxu3 %v32_v4  ;;  %950 = vmatmul.msk.f32.vlgmr.msra.gmra.mxu0 %vm61_vm0, %v33_v5  ;;  %v990_v15 = vld [vmem:[%s1620_s2 + $0x60] sm:$0xff] }
   0xc   :  { %952 = vmatmul.msk.f32.vlgmr.msra.gmra.mxu2 %vm61_vm0, %v35_v6  ;;  %954 = vmatmul.msk.f32.vlgmr.msra.gmra.mxu1 %vm61_vm0, %v33_v5 }
   0xd   :  { %956 = vmatmul.msk.f32.vlgmr.msra.gmra.mxu3 %vm61_vm0, %v35_v6  ;;  %549 = vmatpush.msrb.mxu0 %v31_v3 }
   0xe   :  { %578 = vmatpush.msrb.mxu1 %v32_v4  ;;  %v1014_v40 = vpop.eup %1013 }
   0xf   :  { %v253_v50 = vmul.f32 100.0, %v1014_v40  ;;  %vm257_vm1 = vweird.f32 %v1014_v40 }
  0x10   :  { %53 = vperm.xlu0 %1010, %v39_v7  }
  0x11   :  { %43 = vperm.xlu1 %1011, %v37_v8   ;;  %v254_v0 = vsub.f32 1.0, %v253_v50 }
  0x13   :  { %951 = vmatmul.msk.f32.gmra.mxu0 %vm61_vm0, %v34_v9  ;;  %v255_v8 = vmul.f32 %v1014_v40, %v254_v0  ;;  %v278_v0 = vld [vmem:[#allocation2 + $0x30] sm:$0xff] }
  0x14   :  { %953 = vmatmul.msk.f32.gmra.mxu2 %vm61_vm0, %v36_v10  ;;  %955 = vmatmul.msk.f32.gmra.mxu1 %vm61_vm0, %v34_v9 }
  0x15   :  { %957 = vmatmul.msk.f32.gmra.mxu3 %vm61_vm0, %v36_v10 }
  0x18   :  { %292 = vperm.xlu0 %1010, %v959_v11  }
  0x19   :  { %287 = vperm.xlu1 %1011, %v958_v12  }
  0x20   :  { %679 = vperm.xlu0 %1010, %v988_v13  }
  0x21   :  { %674 = vperm.xlu1 %1011, %v987_v14  }
  0x28   :  { %843 = vperm.xlu0 %1010, %v990_v15  }
  0x7a   :  { %v59_v17 = vpop.permute.xlu0 %58 }
  0x7b   :  { %v49_v16 = vpop.permute.xlu1 %48 }
  0x82   :  { %v54_v27 = vpop.permute.xlu0 %53 }
  0x83   :  { %v44_v18 = vpop.permute.xlu1 %43 }
  0x88   :  { %v91_v19 = vpop.f32.mrf.mxu0 }
  0x89   :  { %v1233_v20 = vadd.f32 %v91_v19, %v44_v18  ;;  %v120_v21 = vpop.f32.mrf.mxu1 }
  0x8a   :  { %v1235_v22 = vadd.f32 %v120_v21, %v44_v18 }
  0x8b   :  { %v132_v23 = vmul.f32 100.0, %v1233_v20 }
  0x8c   :  { %v133_v24 = vmul.f32 100.0, %v1235_v22 }
  0x8d   :  { %v148_v26 = vand.u32 2147483647, %v132_v23 }
  0x8e   :  { %v149_v28 = vand.u32 2147483647, %v133_v24 }
  0x8f   :  { %v97_v29 = vpop.f32.mrf.mxu2  ;;  %v156_v30 = vsub.f32 0.0, %v148_v26 }
  0x90   :  { %v1239_v31 = vadd.f32 %v97_v29, %v54_v27  ;;  %v126_v32 = vpop.f32.mrf.mxu3  ;;  %v157_v33 = vsub.f32 0.0, %v149_v28  ;;  %v94_v35 = vpop.f32.mrf.mxu0 }
  0x91   :  { %v1241_v34 = vadd.f32 %v126_v32, %v54_v27  ;;  %v164_v36 = vmul.f32 1.442695, %v156_v30  ;;  %v1244_v38 = vadd.f32 %v94_v35, %v49_v16  ;;  %v123_v39 = vpop.f32.mrf.mxu1 }
  0x92   :  { %v136_v37 = vmul.f32 100.0, %v1239_v31  ;;  %v166_v41 = vmul.f32 1.442695, %v157_v33  ;;  %v1247_v43 = vadd.f32 %v123_v39, %v49_v16 }
  0x93   :  { %v137_v42 = vmul.f32 100.0, %v1241_v34  ;;  %1015 = vpow2.f32 %v164_v36  ;;  %v134_v45 = vmul.f32 100.0, %v1244_v38 }
  0x94   :  { %v152_v44 = vand.u32 2147483647, %v136_v37  ;;  %v135_v47 = vmul.f32 100.0, %v1247_v43  ;;  %1017 = vpow2.f32 %v166_v41 }
  0x95   :  { %v153_v46 = vand.u32 2147483647, %v137_v42  ;;  %v150_v49 = vand.u32 2147483647, %v134_v45 }
  0x96   :  { %v160_v48 = vsub.f32 0.0, %v152_v44  ;;  %v151_v52 = vand.u32 2147483647, %v135_v47 }
  0x97   :  { %v161_v51 = vsub.f32 0.0, %v153_v46  ;;  %v100_v53 = vpop.f32.mrf.mxu2  ;;  %v158_v55 = vsub.f32 0.0, %v150_v49 }
  0x98   :  { %v172_v54 = vmul.f32 1.442695, %v160_v48  ;;  %v1251_v56 = vadd.f32 %v100_v53, %v59_v17  ;;  %v129_v57 = vpop.f32.mrf.mxu3  ;;  %v159_v59 = vsub.f32 0.0, %v151_v52 }
  0x99   :  { %v174_v58 = vmul.f32 1.442695, %v161_v51  ;;  %v1253_v60 = vadd.f32 %v129_v57, %v59_v17  ;;  %v1255_v61 = vpop.eup %1015  ;;  %v168_v62 = vmul.f32 1.442695, %v158_v55  ;;  %v256_v17 = vadd.f32 %v1014_v40, %v255_v8 }
  0x9a   :  { %1019 = vpow2.f32 %v172_v54  ;;  %v138_v63 = vmul.f32 100.0, %v1251_v56  ;;  %v170_v1 = vmul.f32 1.442695, %v159_v59  ;;  %v1259_v4 = vpop.eup %1017  ;;  %v180_v6 = vadd.f32 1.0, %v1255_v61 }
  0x9b   :  { %1021 = vpow2.f32 %v174_v58  ;;  %v139_v2 = vmul.f32 100.0, %v1253_v60  ;;  %v189_v12 = vadd.f32 1.0, %v1259_v4  ;;  %v183_v23 = vmul.f32 -0.5, %v1255_v61 }
  0x9c   :  { %1023 = vpow2.f32 %v168_v62  ;;  %v154_v3 = vand.u32 2147483647, %v138_v63  ;;  %v1270_v26 = vsel %vm257_vm1, %v1014_v40, %v256_v17  ;;  %v146_v28 = vmax.f32 %v1251_v56, 0.0 }
  0x9d   :  { %1025 = vpow2.f32 %v170_v1  ;;  %v155_v5 = vand.u32 2147483647, %v139_v2  ;;  %v186_v30 = vand.u32 2147483647, %v1255_v61  ;;  %v184_v35 = vadd.f32 1.0, %v183_v23 }
  0x9e   :  { %v162_v7 = vsub.f32 0.0, %v154_v3  ;;  %1027 = vlog2.f32 %v180_v6  ;;  %v192_v36 = vmul.f32 -0.5, %v1259_v4  ;;  %v195_v53 = vand.u32 2147483647, %v1259_v4 }
  0x9f   :  { %v163_v9 = vsub.f32 0.0, %v155_v5  ;;  %vm1278_vm2 = vcmp.lt.f32.partialorder %v186_v30, 0.0004427343  ;;  %v185_v57 = vmul.f32 %v1255_v61, %v184_v35  ;;  %v143_v56 = vmax.f32 %v1247_v43, 0.0  ;;  %v960_v43 = vld [vmem:[%s1620_s2 + $0x30] sm:$0xff] }
  0xa0   :  { %v1020_v10 = vpop.eup %1019  ;;  %v176_v11 = vmul.f32 1.442695, %v162_v7  ;;  %v193_v58 = vadd.f32 1.0, %v192_v36  ;;  %vm1310_vm9 = vcmp.lt.f32.partialorder %v195_v53, 0.0004427343  ;;  %v142_v53 = vmax.f32 %v1244_v38, 0.0 }
  0xa1   :  { %v1263_v13 = vpop.eup %1021  ;;  %v178_v14 = vmul.f32 1.442695, %v163_v9  ;;  %v216_v15 = vadd.f32 1.0, %v1020_v10  ;;  %v219_v24 = vmul.f32 -0.5, %v1020_v10  ;;  %v222_v40 = vand.u32 2147483647, %v1020_v10 }
  0xa2   :  { %v1024_v16 = vpop.eup %1023  ;;  %1029 = vpow2.f32 %v176_v11  ;;  %v225_v18 = vadd.f32 1.0, %v1263_v13  ;;  %v228_v29 = vmul.f32 -0.5, %v1263_v13  ;;  %v231_v42 = vand.u32 2147483647, %v1263_v13 }
  0xa3   :  { %v1266_v19 = vpop.eup %1025  ;;  %1031 = vpow2.f32 %v178_v14  ;;  %v198_v21 = vadd.f32 1.0, %v1024_v16  ;;  %v201_v33 = vmul.f32 -0.5, %v1024_v16  ;;  %v220_v41 = vadd.f32 1.0, %v219_v24 }
  0xa4   :  { %1033 = vlog2.f32 %v189_v12  ;;  %v207_v25 = vadd.f32 1.0, %v1266_v19  ;;  %v1028_v27 = vpop.eup %1027  ;;  %v204_v47 = vand.u32 2147483647, %v1024_v16  ;;  %v210_v48 = vmul.f32 -0.5, %v1266_v19 }
  0xa5   :  { %1035 = vlog2.f32 %v216_v15  ;;  %v229_v51 = vadd.f32 1.0, %v228_v29  ;;  %v202_v55 = vadd.f32 1.0, %v201_v33  ;;  %v221_v62 = vmul.f32 %v1020_v10, %v220_v41 }
  0xa6   :  { %1037 = vlog2.f32 %v225_v18  ;;  %vm1284_vm3 = vcmp.lt.f32.partialorder %v222_v40, 0.0004427343  ;;  %vm1288_vm4 = vcmp.lt.f32.partialorder %v231_v42, 0.0004427343  ;;  %v213_v1 = vand.u32 2147483647, %v1266_v19 }
  0xa7   :  { %1039 = vlog2.f32 %v198_v21  ;;  %vm1293_vm5 = vcmp.lt.f32.partialorder %v204_v47, 0.0004427343  ;;  %v211_v61 = vadd.f32 1.0, %v210_v48  ;;  %v230_v10 = vmul.f32 %v1263_v13, %v229_v51 }
  0xa8   :  { %v1030_v32 = vpop.eup %1029  ;;  %1041 = vlog2.f32 %v207_v25  ;;  %v203_v14 = vmul.f32 %v1024_v16, %v202_v55  ;;  %v182_v15 = vmul.f32 0.6931472, %v1028_v27  ;;  %vm1298_vm6 = vcmp.lt.f32.partialorder %v213_v1, 0.0004427343  ;;  %v986_v1 = vld [vmem:[%s1620_s2 + $0x40] sm:$0xff] }
  0xa9   :  { %v1032_v37 = vpop.eup %1031  ;;  %v234_v39 = vadd.f32 1.0, %v1030_v32  ;;  %v237_v45 = vmul.f32 -0.5, %v1030_v32  ;;  %v240_v7 = vand.u32 2147483647, %v1030_v32  ;;  %v194_v24 = vmul.f32 %v1259_v4, %v193_v58 }
  0xaa   :  { %v1034_v44 = vpop.eup %1033  ;;  %v243_v46 = vadd.f32 1.0, %v1032_v37  ;;  %v246_v50 = vmul.f32 -0.5, %v1032_v37  ;;  %v249_v11 = vand.u32 2147483647, %v1032_v37  ;;  %v212_v13 = vmul.f32 %v1266_v19, %v211_v61 }
  0xab   :  { %v1036_v49 = vpop.eup %1035  ;;  %1043 = vlog2.f32 %v234_v39  ;;  %v238_v3 = vadd.f32 1.0, %v237_v45  ;;  %v191_v23 = vmul.f32 0.6931472, %v1034_v44  ;;  %vm241_vm7 = vcmp.lt.f32.partialorder %v240_v7, 0.0004427343 }
  0xac   :  { %v1038_v54 = vpop.eup %1037  ;;  %1045 = vlog2.f32 %v243_v46  ;;  %v218_v5 = vmul.f32 0.6931472, %v1036_v49  ;;  %v247_v8 = vadd.f32 1.0, %v246_v50  ;;  %vm250_vm8 = vcmp.lt.f32.partialorder %v249_v11, 0.0004427343 }
  0xad   :  { %v1040_v59 = vpop.eup %1039  ;;  %v227_v9 = vmul.f32 0.6931472, %v1038_v54  ;;  %v239_v30 = vmul.f32 %v1030_v32, %v238_v3  ;;  %v147_v40 = vmax.f32 %v1253_v60, 0.0  ;;  %v188_v45 = vsel %vm1278_vm2, %v185_v57, %v182_v15  ;;  %v288_v3 = vpop.permute.xlu1 %287 }
  0xae   :  { %v1042_v2 = vpop.eup %1041  ;;  %v200_v12 = vmul.f32 0.6931472, %v1040_v59  ;;  %v224_v33 = vsel %vm1284_vm3, %v221_v62, %v218_v5  ;;  %v248_v27 = vmul.f32 %v1032_v37, %v247_v8  ;;  %v144_v46 = vmax.f32 %v1239_v31, 0.0  ;;  %v961_v31 = vld [vmem:[%s1620_s2 + $0x38] sm:$0xff]  ;;  %v276_v62 = vld [vmem:[#allocation2 + $0x20] sm:$0xff] }
  0xaf   :  { %v209_v18 = vmul.f32 0.6931472, %v1042_v2  ;;  %v233_v35 = vsel %vm1288_vm4, %v230_v10, %v227_v9  ;;  %v263_v19 = vmul.f32 %v1270_v26, %v224_v33  ;;  %v197_v49 = vsel %vm1310_vm9, %v194_v24, %v191_v23  ;;  %302 = vperm.xlu2 %1012, %v961_v31   ;;  %v279_v2 = vld [vmem:[#allocation2 + $0x38] sm:$0xff]  ;;  %v293_v10 = vpop.permute.xlu0 %292 }
  0xb0   :  { %v206_v39 = vsel %vm1293_vm5, %v203_v14, %v200_v12  ;;  %v264_v44 = vmul.f32 %v1270_v26, %v233_v35  ;;  %v145_v50 = vmax.f32 %v1241_v34, 0.0  ;;  %v259_v54 = vmul.f32 %v1270_v26, %v188_v45 }
  0xb1   :  { %v1044_v17 = vpop.eup %1043  ;;  %v215_v37 = vsel %vm1298_vm6, %v212_v13, %v209_v18  ;;  %v261_v48 = vmul.f32 %v1270_v26, %v206_v39  ;;  %v271_v52 = vadd.f32 %v263_v19, %v144_v46  ;;  %v260_v55 = vmul.f32 %v1270_v26, %v197_v49 }
  0xb2   :  { %v1046_v25 = vpop.eup %1045  ;;  %v236_v29 = vmul.f32 0.6931472, %v1044_v17  ;;  %v262_v51 = vmul.f32 %v1270_v26, %v215_v37  ;;  %v140_v34 = vmax.f32 %v1233_v20, 0.0  ;;  %v141_v38 = vmax.f32 %v1235_v22, 0.0  ;;  %v277_v20 = vld [vmem:[#allocation2 + $0x28] sm:$0xff]  ;;  %v989_v22 = vld [vmem:[%s1620_s2 + $0x58] sm:$0xff] }
  0xb3   :  { %v245_v16 = vmul.f32 0.6931472, %v1046_v25  ;;  %v269_v57 = vadd.f32 %v261_v48, %v142_v53  ;;  %s1168_s2 = smov [#allocation5]  }
  0xb4   :  { %v242_v36 = vsel %vm241_vm7, %v239_v30, %v236_v29  ;;  %v270_v58 = vadd.f32 %v262_v51, %v143_v56  ;;  %v267_v59 = vadd.f32 %v259_v54, %v140_v34  ;;  %v268_v63 = vadd.f32 %v260_v55, %v141_v38  ;;  %s938_s20 = sshll.u32 %s1168_s2, 4  ;;  %s939_s20 = int_to_ptr.vmem [resolvable:$true] %s938_s20 }
  0xb5   :  { %v265_v32 = vmul.f32 %v1270_v26, %v242_v36  ;;  %v251_v41 = vsel %vm250_vm8, %v248_v27, %v245_v16 }
  0xb6   :  { %v266_v42 = vmul.f32 %v1270_v26, %v251_v41 }
  0xb7   :  { %v273_v47 = vadd.f32 %v265_v32, %v146_v28  ;;  %v272_v28 = vadd.f32 %v264_v44, %v145_v50  ;;  %297 = vperm.xlu2 %1012, %v960_v43  }
  0xb8   :  { %v274_v60 = vadd.f32 %v266_v42, %v147_v40 }
  0xb9   :  { %330 = vmatpush.msrb.mxu2 %v273_v47 }
  0xba   :  { %359 = vmatpush.msrb.mxu3 %v274_v60 }
  0xbb   :  { %331 = vmatpush.msrb.mxu2 %v271_v52 }
  0xbc   :  { %360 = vmatpush.msrb.mxu3 %v272_v28 }
  0xbd   :  { %332 = vmatpush.msrb.mxu2 %v269_v57 }
  0xbe   :  { %361 = vmatpush.msrb.mxu3 %v270_v58 }
  0xbf   :  { %333 = vmatpush.msrb.mxu2 %v267_v59  ;;  %684 = vperm.xlu2 %1012, %v989_v22  }
  0xc0   :  { %362 = vmatpush.msrb.mxu3 %v268_v63  ;;  %962 = vmatmul.msk.f32.vlgmr.msrb.gmra.mxu2 %vm305_vm10, %v276_v62 }
  0xc1   :  { %966 = vmatmul.msk.f32.vlgmr.msrb.gmra.mxu3 %vm305_vm10, %v276_v62 }
  0xc7   :  { %669 = vperm.xlu2 %1012, %v986_v1  }
  0xc8   :  { %963 = vmatmul.msk.f32.gmra.mxu2 %vm305_vm10, %v277_v20 }
  0xc9   :  { %967 = vmatmul.msk.f32.gmra.mxu3 %vm305_vm10, %v277_v20 }
  0xd0   :  { %964 = vmatmul.msk.f32.gmra.mxu2 %vm305_vm10, %v278_v0 }
  0xd1   :  { %968 = vmatmul.msk.f32.gmra.mxu3 %vm305_vm10, %v278_v0 }
  0xd8   :  { %965 = vmatmul.msk.f32.gmra.mxu2 %vm305_vm10, %v279_v2 }
  0xd9   :  { %969 = vmatmul.msk.f32.gmra.mxu3 %vm305_vm10, %v279_v2 }
 0x109   :  { %v303_v9 = vpop.permute.xlu2 %302 }
 0x111   :  { %v298_v13 = vpop.permute.xlu2 %297 }
 0x143   :  { %v335_v5 = vpop.f32.mrf.mxu2 }
 0x144   :  { %v1357_v6 = vadd.f32 %v335_v5, %v288_v3  ;;  %v364_v61 = vpop.f32.mrf.mxu3 }
 0x145   :  { %v1359_v7 = vadd.f32 %v364_v61, %v288_v3  ;;  %v518_v3 = vld [vmem:[#allocation2 + $0x60] sm:$0xff] }
 0x146   :  { %v376_v8 = vmul.f32 100.0, %v1357_v6  ;;  %970 = vmatmul.msk.f32.vlgmr.msrb.gmra.mxu0 %vm61_vm0, %v518_v3  ;;  %974 = vmatmul.msk.f32.vlgmr.msrb.gmra.mxu1 %vm61_vm0, %v518_v3 }
 0x147   :  { %v377_v11 = vmul.f32 100.0, %v1359_v7 }
 0x148   :  { %v392_v14 = vand.u32 2147483647, %v376_v8 }
 0x149   :  { %v393_v23 = vand.u32 2147483647, %v377_v11 }
 0x14a   :  { %v400_v25 = vsub.f32 0.0, %v392_v14 }
 0x14b   :  { %v338_v12 = vpop.f32.mrf.mxu2  ;;  %v401_v33 = vsub.f32 0.0, %v393_v23 }
 0x14c   :  { %v1363_v15 = vadd.f32 %v338_v12, %v293_v10  ;;  %v367_v17 = vpop.f32.mrf.mxu3  ;;  %v408_v27 = vmul.f32 1.442695, %v400_v25 }
 0x14d   :  { %v1365_v18 = vadd.f32 %v367_v17, %v293_v10  ;;  %v410_v19 = vmul.f32 1.442695, %v401_v33  ;;  %v519_v33 = vld [vmem:[#allocation2 + $0x68] sm:$0xff] }
 0x14e   :  { %v378_v21 = vmul.f32 100.0, %v1363_v15  ;;  %1047 = vpow2.f32 %v408_v27  ;;  %971 = vmatmul.msk.f32.gmra.mxu0 %vm61_vm0, %v519_v33  ;;  %975 = vmatmul.msk.f32.gmra.mxu1 %vm61_vm0, %v519_v33 }
 0x14f   :  { %v379_v24 = vmul.f32 100.0, %v1365_v18  ;;  %1049 = vpow2.f32 %v410_v19 }
 0x150   :  { %v394_v29 = vand.u32 2147483647, %v378_v21 }
 0x151   :  { %v395_v30 = vand.u32 2147483647, %v379_v24 }
 0x152   :  { %v402_v35 = vsub.f32 0.0, %v394_v29 }
 0x153   :  { %v341_v16 = vpop.f32.mrf.mxu2  ;;  %v403_v4 = vsub.f32 0.0, %v395_v30 }
 0x154   :  { %v1369_v36 = vadd.f32 %v341_v16, %v298_v13  ;;  %v370_v39 = vpop.f32.mrf.mxu3  ;;  %v412_v40 = vmul.f32 1.442695, %v402_v35  ;;  %v1379_v52 = vpop.eup %1047 }
 0x155   :  { %v1371_v32 = vadd.f32 %v370_v39, %v298_v13  ;;  %v414_v44 = vmul.f32 1.442695, %v403_v4  ;;  %v1383_v28 = vpop.eup %1049  ;;  %v424_v34 = vadd.f32 1.0, %v1379_v52  ;;  %v427_v43 = vmul.f32 -0.5, %v1379_v52 }
 0x156   :  { %v380_v41 = vmul.f32 100.0, %v1369_v36  ;;  %1051 = vpow2.f32 %v412_v40  ;;  %v433_v20 = vadd.f32 1.0, %v1383_v28  ;;  %v436_v11 = vmul.f32 -0.5, %v1383_v28 }
 0x157   :  { %v381_v37 = vmul.f32 100.0, %v1371_v32  ;;  %1053 = vpow2.f32 %v414_v44  ;;  %v428_v8 = vadd.f32 1.0, %v427_v43  ;;  %v430_v21 = vand.u32 2147483647, %v1379_v52 }
 0x158   :  { %v396_v42 = vand.u32 2147483647, %v380_v41  ;;  %v439_v30 = vand.u32 2147483647, %v1383_v28  ;;  %v389_v19 = vmax.f32 %v1371_v32, 0.0 }
 0x159   :  { %v397_v45 = vand.u32 2147483647, %v381_v37  ;;  %v1406_v17 = vmul.f32 %v1379_v52, %v428_v8  ;;  %v437_v37 = vadd.f32 1.0, %v436_v11  ;;  %vm1422_vm12 = vcmp.lt.f32.partialorder %v430_v21, 0.0004427343 }
 0x15a   :  { %v404_v46 = vsub.f32 0.0, %v396_v42  ;;  %vm1430_vm14 = vcmp.lt.f32.partialorder %v439_v30, 0.0004427343 }
 0x15b   :  { %v405_v47 = vsub.f32 0.0, %v397_v45  ;;  %v344_v48 = vpop.f32.mrf.mxu2 }
 0x15c   :  { %v416_v49 = vmul.f32 1.442695, %v404_v46  ;;  %v1375_v50 = vadd.f32 %v344_v48, %v303_v9  ;;  %v373_v60 = vpop.f32.mrf.mxu3  ;;  %v1386_v57 = vpop.eup %1051 }
 0x15d   :  { %v418_v51 = vmul.f32 1.442695, %v405_v47  ;;  %v1377_v53 = vadd.f32 %v373_v60, %v303_v9  ;;  %v1388_v58 = vpop.eup %1053  ;;  %v442_v5 = vadd.f32 1.0, %v1386_v57  ;;  %v448_v10 = vand.u32 2147483647, %v1386_v57  ;;  %v513_v60 = vld [vmem:[#allocation2 + $0x40] sm:$0xff] }
 0x15e   :  { %1055 = vpow2.f32 %v416_v49  ;;  %v382_v54 = vmul.f32 100.0, %v1375_v50  ;;  %v451_v61 = vadd.f32 1.0, %v1388_v58  ;;  %v445_v29 = vmul.f32 -0.5, %v1386_v57 }
 0x15f   :  { %1057 = vpow2.f32 %v418_v51  ;;  %v383_v31 = vmul.f32 100.0, %v1377_v53  ;;  %v454_v35 = vmul.f32 -0.5, %v1388_v58  ;;  %v457_v39 = vand.u32 2147483647, %v1388_v58 }
 0x160   :  { %v398_v56 = vand.u32 2147483647, %v382_v54  ;;  %1059 = vlog2.f32 %v424_v34  ;;  %vm1414_vm11 = vcmp.lt.f32.partialorder %v448_v10, 0.0004427343  ;;  %v446_v49 = vadd.f32 1.0, %v445_v29 }
 0x161   :  { %v399_v55 = vand.u32 2147483647, %v383_v31  ;;  %vm1426_vm13 = vcmp.lt.f32.partialorder %v457_v39, 0.0004427343  ;;  %v438_v29 = vmul.f32 %v1383_v28, %v437_v37  ;;  %v388_v28 = vmax.f32 %v1369_v36, 0.0 }
 0x162   :  { %v406_v38 = vsub.f32 0.0, %v398_v56  ;;  %v455_v56 = vadd.f32 1.0, %v454_v35  ;;  %v387_v36 = vmax.f32 %v1365_v18, 0.0 }
 0x163   :  { %v407_v59 = vsub.f32 0.0, %v399_v55 }
 0x164   :  { %v1390_v62 = vpop.eup %1055  ;;  %v420_v63 = vmul.f32 1.442695, %v406_v38  ;;  %v390_v38 = vmax.f32 %v1375_v50, 0.0  ;;  %v447_v50 = vmul.f32 %v1386_v57, %v446_v49  ;;  %v456_v21 = vmul.f32 %v1388_v58, %v455_v56 }
 0x165   :  { %v1394_v22 = vpop.eup %1057  ;;  %v422_v0 = vmul.f32 1.442695, %v407_v59  ;;  %v460_v1 = vadd.f32 1.0, %v1390_v62  ;;  %v463_v14 = vmul.f32 -0.5, %v1390_v62  ;;  %v466_v44 = vand.u32 2147483647, %v1390_v62 }
 0x166   :  { %1061 = vpow2.f32 %v420_v63  ;;  %v469_v2 = vadd.f32 1.0, %v1394_v22  ;;  %v1060_v9 = vpop.eup %1059  ;;  %v472_v25 = vmul.f32 -0.5, %v1394_v22  ;;  %v475_v48 = vand.u32 2147483647, %v1394_v22 }
 0x167   :  { %1063 = vpow2.f32 %v422_v0  ;;  %v464_v42 = vadd.f32 1.0, %v463_v14  ;;  %v426_v45 = vmul.f32 0.6931472, %v1060_v9  ;;  %vm1436_vm15 = vcmp.lt.f32.partialorder %v466_v44, 0.0004427343  ;;  %v520_v9 = vld [vmem:[#allocation2 + $0x70] sm:$0xff] }
 0x168   :  { %1065 = vlog2.f32 %v433_v20  ;;  %v473_v47 = vadd.f32 1.0, %v472_v25  ;;  %vm1441_vm1 = vcmp.lt.f32.partialorder %v475_v48, 0.0004427343  ;;  %972 = vmatmul.msk.f32.gmra.mxu0 %vm61_vm0, %v520_v9  ;;  %976 = vmatmul.msk.f32.gmra.mxu1 %vm61_vm0, %v520_v9  ;;  %v385_v48 = vmax.f32 %v1359_v7, 0.0  ;;  %v515_v7 = vld [vmem:[#allocation2 + $0x50] sm:$0xff] }
 0x169   :  { %1067 = vlog2.f32 %v460_v1  ;;  %v465_v0 = vmul.f32 %v1390_v62, %v464_v42  ;;  %v432_v35 = vsel %vm1422_vm12, %v1406_v17, %v426_v45  ;;  %v521_v17 = vld [vmem:[#allocation2 + $0x78] sm:$0xff]  ;;  %vm925_vm12 = vcmask 1040384  }
 0x16a   :  { %1069 = vlog2.f32 %v469_v2  ;;  %v496_v44 = vmul.f32 %v432_v35, %v1270_v26 }
 0x16b   :  { %1071 = vlog2.f32 %v442_v5  ;;  %v474_v5 = vmul.f32 %v1394_v22, %v473_v47  ;;  %v384_v47 = vmax.f32 %v1357_v6, 0.0  ;;  %v514_v6 = vld [vmem:[#allocation2 + $0x48] sm:$0xff] }
 0x16c   :  { %v1062_v12 = vpop.eup %1061  ;;  %1073 = vlog2.f32 %v451_v61  ;;  %v675_v61 = vpop.permute.xlu1 %674 }
 0x16d   :  { %v1064_v23 = vpop.eup %1063  ;;  %v478_v24 = vadd.f32 1.0, %v1062_v12  ;;  %v481_v16 = vmul.f32 -0.5, %v1062_v12  ;;  %v484_v59 = vand.u32 2147483647, %v1062_v12  ;;  %v504_v49 = vadd.f32 %v496_v44, %v384_v47 }
 0x16e   :  { %v1066_v13 = vpop.eup %1065  ;;  %v487_v27 = vadd.f32 1.0, %v1064_v23  ;;  %v490_v41 = vmul.f32 -0.5, %v1064_v23  ;;  %v493_v20 = vand.u32 2147483647, %v1064_v23 }
 0x16f   :  { %v1068_v4 = vpop.eup %1067  ;;  %1075 = vlog2.f32 %v478_v24  ;;  %v435_v51 = vmul.f32 0.6931472, %v1066_v13  ;;  %v482_v54 = vadd.f32 1.0, %v481_v16  ;;  %vm485_vm2 = vcmp.lt.f32.partialorder %v484_v59, 0.0004427343 }
 0x170   :  { %v1070_v40 = vpop.eup %1069  ;;  %1077 = vlog2.f32 %v487_v27  ;;  %v462_v31 = vmul.f32 0.6931472, %v1068_v4  ;;  %v491_v63 = vadd.f32 1.0, %v490_v41  ;;  %vm494_vm3 = vcmp.lt.f32.partialorder %v493_v20, 0.0004427343  ;;  %973 = vmatmul.msk.f32.gmra.mxu0 %vm61_vm0, %v521_v17  ;;  %977 = vmatmul.msk.f32.gmra.mxu1 %vm61_vm0, %v521_v17 }
 0x171   :  { %v1072_v46 = vpop.eup %1071  ;;  %v471_v43 = vmul.f32 0.6931472, %v1070_v40  ;;  %v483_v14 = vmul.f32 %v1062_v12, %v482_v54  ;;  %v391_v13 = vmax.f32 %v1377_v53, 0.0  ;;  %v441_v41 = vsel %vm1430_vm14, %v438_v29, %v435_v51  ;;  %v516_v51 = vld [vmem:[#allocation2 + $0x58] sm:$0xff] }
 0x172   :  { %v1074_v52 = vpop.eup %1073  ;;  %v444_v2 = vmul.f32 0.6931472, %v1072_v46  ;;  %v468_v62 = vsel %vm1436_vm15, %v465_v0, %v462_v31  ;;  %v492_v25 = vmul.f32 %v1064_v23, %v491_v63  ;;  %v386_v40 = vmax.f32 %v1363_v15, 0.0 }
 0x173   :  { %v453_v8 = vmul.f32 0.6931472, %v1074_v52  ;;  %v477_v22 = vsel %vm1441_vm1, %v474_v5, %v471_v43  ;;  %v500_v33 = vmul.f32 %v468_v62, %v1270_v26  ;;  %v497_v46 = vmul.f32 %v441_v41, %v1270_v26  ;;  %v1488_v52 = vpop.permute.xlu2 %684 }
 0x174   :  { %v450_v12 = vsel %vm1414_vm11, %v447_v50, %v444_v2  ;;  %v501_v27 = vmul.f32 %v477_v22, %v1270_v26 }
 0x175   :  { %v1076_v3 = vpop.eup %1075  ;;  %v459_v23 = vsel %vm1426_vm13, %v456_v21, %v453_v8  ;;  %v498_v4 = vmul.f32 %v450_v12, %v1270_v26  ;;  %v508_v42 = vadd.f32 %v500_v33, %v388_v28  ;;  %v505_v18 = vadd.f32 %v497_v46, %v385_v48  ;;  %v680_v33 = vpop.permute.xlu0 %679 }
 0x176   :  { %v1078_v10 = vpop.eup %1077  ;;  %v480_v11 = vmul.f32 0.6931472, %v1076_v3  ;;  %v499_v53 = vmul.f32 %v459_v23, %v1270_v26  ;;  %v509_v45 = vadd.f32 %v501_v27, %v389_v19 }
 0x177   :  { %v489_v24 = vmul.f32 0.6931472, %v1078_v10  ;;  %v506_v32 = vadd.f32 %v498_v4, %v386_v40 }
 0x178   :  { %v486_v57 = vsel %vm485_vm2, %v483_v14, %v480_v11  ;;  %v507_v15 = vadd.f32 %v499_v53, %v387_v36 }
 0x179   :  { %v502_v30 = vmul.f32 %v486_v57, %v1270_v26  ;;  %v495_v58 = vsel %vm494_vm3, %v492_v25, %v489_v24 }
 0x17a   :  { %v503_v16 = vmul.f32 %v495_v58, %v1270_v26 }
 0x17b   :  { %v510_v39 = vadd.f32 %v502_v30, %v390_v38  ;;  %v670_v38 = vpop.permute.xlu2 %669 }
 0x17c   :  { %v511_v37 = vadd.f32 %v503_v16, %v391_v13 }
 0x17d   :  { %616 = vmatpush.msra.mxu2 %v510_v39 }
 0x17e   :  { %645 = vmatpush.msra.mxu3 %v511_v37 }
 0x17f   :  { %617 = vmatpush.msra.mxu2 %v508_v42 }
 0x180   :  { %646 = vmatpush.msra.mxu3 %v509_v45 }
 0x181   :  { %618 = vmatpush.msra.mxu2 %v506_v32 }
 0x182   :  { %647 = vmatpush.msra.mxu3 %v507_v15 }
 0x183   :  { %619 = vmatpush.msra.mxu2 %v504_v49 }
 0x184   :  { %648 = vmatpush.msra.mxu3 %v505_v18  ;;  %978 = vmatmul.msk.f32.vlgmr.msra.gmra.mxu2 %vm305_vm10, %v513_v60 }
 0x185   :  { %982 = vmatmul.msk.f32.vlgmr.msra.gmra.mxu3 %vm305_vm10, %v513_v60 }
 0x18c   :  { %979 = vmatmul.msk.f32.gmra.mxu2 %vm305_vm10, %v514_v6 }
 0x18d   :  { %983 = vmatmul.msk.f32.gmra.mxu3 %vm305_vm10, %v514_v6 }
 0x194   :  { %980 = vmatmul.msk.f32.gmra.mxu2 %vm305_vm10, %v515_v7 }
 0x195   :  { %984 = vmatmul.msk.f32.gmra.mxu3 %vm305_vm10, %v515_v7 }
 0x19c   :  { %981 = vmatmul.msk.f32.gmra.mxu2 %vm305_vm10, %v516_v51 }
 0x19d   :  { %985 = vmatmul.msk.f32.gmra.mxu3 %vm305_vm10, %v516_v51 }
 0x1c3   :  { %v551_v54 = vpop.f32.mrf.mxu0  ;;  %v580_v31 = vpop.f32.mrf.mxu1 }
 0x1cb   :  { %v554_v63 = vpop.f32.mrf.mxu0  ;;  %v583_v20 = vpop.f32.mrf.mxu1 }
 0x1e5   :  { %v557_v14 = vpop.f32.mrf.mxu0  ;;  %v586_v21 = vpop.f32.mrf.mxu1 }
 0x1ed   :  { %v560_v37 = vpop.f32.mrf.mxu0  ;;  %v589_v42 = vpop.f32.mrf.mxu1 }
 0x207   :  { %v621_v56 = vpop.f32.mrf.mxu2 }
 0x208   :  { %v622_v55 = vadd.f32 %v621_v56, %v551_v54  ;;  %v650_v34 = vpop.f32.mrf.mxu3 }
 0x209   :  { %v651_v59 = vadd.f32 %v650_v34, %v580_v31 }
 0x20a   :  { %v1490_v43 = vadd.f32 %v670_v38, %v622_v55 }
 0x20b   :  { %v1492_v0 = vadd.f32 %v670_v38, %v651_v59 }
 0x20c   :  { %v695_v1 = vmul.f32 100.0, %v1490_v43 }
 0x20d   :  { %v696_v50 = vmul.f32 100.0, %v1492_v0 }
 0x20e   :  { %v711_v9 = vand.u32 2147483647, %v695_v1 }
 0x20f   :  { %v624_v2 = vpop.f32.mrf.mxu2  ;;  %v712_v24 = vand.u32 2147483647, %v696_v50 }
 0x210   :  { %v625_v3 = vadd.f32 %v624_v2, %v554_v63  ;;  %v653_v5 = vpop.f32.mrf.mxu3  ;;  %v719_v22 = vsub.f32 0.0, %v711_v9 }
 0x211   :  { %v654_v8 = vadd.f32 %v653_v5, %v583_v20  ;;  %v720_v23 = vsub.f32 0.0, %v712_v24 }
 0x212   :  { %v1496_v10 = vadd.f32 %v675_v61, %v625_v3  ;;  %v727_v16 = vmul.f32 1.442695, %v719_v22 }
 0x213   :  { %v1498_v11 = vadd.f32 %v675_v61, %v654_v8  ;;  %v729_v41 = vmul.f32 1.442695, %v720_v23 }
 0x214   :  { %v697_v62 = vmul.f32 100.0, %v1496_v10  ;;  %1079 = vpow2.f32 %v727_v16 }
 0x215   :  { %v698_v25 = vmul.f32 100.0, %v1498_v11  ;;  %1081 = vpow2.f32 %v729_v41 }
 0x216   :  { %v713_v57 = vand.u32 2147483647, %v697_v62 }
 0x217   :  { %v714_v12 = vand.u32 2147483647, %v698_v25  ;;  %v627_v29 = vpop.f32.mrf.mxu2 }
 0x218   :  { %v628_v30 = vadd.f32 %v627_v29, %v557_v14  ;;  %v656_v58 = vpop.f32.mrf.mxu3  ;;  %v721_v27 = vsub.f32 0.0, %v713_v57 }
 0x219   :  { %v657_v13 = vadd.f32 %v656_v58, %v586_v21  ;;  %v722_v28 = vsub.f32 0.0, %v714_v12 }
 0x21a   :  { %v1502_v35 = vadd.f32 %v680_v33, %v628_v30  ;;  %v731_v53 = vmul.f32 1.442695, %v721_v27  ;;  %v1514_v6 = vpop.eup %1079 }
 0x21b   :  { %v1504_v39 = vadd.f32 %v680_v33, %v657_v13  ;;  %v733_v44 = vmul.f32 1.442695, %v722_v28  ;;  %v1518_v31 = vpop.eup %1081  ;;  %v743_v55 = vadd.f32 1.0, %v1514_v6  ;;  %v746_v61 = vmul.f32 -0.5, %v1514_v6 }
 0x21c   :  { %v699_v4 = vmul.f32 100.0, %v1502_v35  ;;  %1083 = vpow2.f32 %v731_v53  ;;  %v752_v1 = vadd.f32 1.0, %v1518_v31  ;;  %v755_v62 = vmul.f32 -0.5, %v1518_v31 }
 0x21d   :  { %v700_v19 = vmul.f32 100.0, %v1504_v39  ;;  %1085 = vpow2.f32 %v733_v44  ;;  %v747_v14 = vadd.f32 1.0, %v746_v61  ;;  %v749_v12 = vand.u32 2147483647, %v1514_v6 }
 0x21e   :  { %v715_v40 = vand.u32 2147483647, %v699_v4  ;;  %v758_v23 = vand.u32 2147483647, %v1518_v31  ;;  %v756_v4 = vadd.f32 1.0, %v755_v62  ;;  %v705_v53 = vmax.f32 %v1496_v10, 0.0 }
 0x21f   :  { %v716_v17 = vand.u32 2147483647, %v700_v19  ;;  %v630_v36 = vpop.f32.mrf.mxu2  ;;  %v1542_v33 = vmul.f32 %v1514_v6, %v747_v14  ;;  %vm1554_vm4 = vcmp.lt.f32.partialorder %v749_v12, 0.0004427343 }
 0x220   :  { %v723_v45 = vsub.f32 0.0, %v715_v40  ;;  %v631_v46 = vadd.f32 %v630_v36, %v560_v37  ;;  %v659_v47 = vpop.f32.mrf.mxu3  ;;  %vm1558_vm5 = vcmp.lt.f32.partialorder %v758_v23, 0.0004427343 }
 0x221   :  { %v724_v32 = vsub.f32 0.0, %v716_v17  ;;  %v660_v48 = vadd.f32 %v659_v47, %v589_v42 }
 0x222   :  { %v735_v15 = vmul.f32 1.442695, %v723_v45  ;;  %v1509_v49 = vadd.f32 %v1488_v52, %v631_v46  ;;  %v1521_v34 = vpop.eup %1083 }
 0x223   :  { %v737_v60 = vmul.f32 1.442695, %v724_v32  ;;  %v1512_v18 = vadd.f32 %v1488_v52, %v660_v48  ;;  %v1523_v59 = vpop.eup %1085  ;;  %v761_v8 = vadd.f32 1.0, %v1521_v34  ;;  %v764_v24 = vmul.f32 -0.5, %v1521_v34  ;;  %v844_v48 = vpop.permute.xlu0 %843 }
 0x224   :  { %1087 = vpow2.f32 %v735_v15  ;;  %v701_v7 = vmul.f32 100.0, %v1509_v49  ;;  %v770_v9 = vadd.f32 1.0, %v1523_v59  ;;  %v767_v25 = vand.u32 2147483647, %v1521_v34 }
 0x225   :  { %1089 = vpow2.f32 %v737_v60  ;;  %v702_v51 = vmul.f32 100.0, %v1512_v18  ;;  %v773_v28 = vmul.f32 -0.5, %v1523_v59  ;;  %v765_v37 = vadd.f32 1.0, %v764_v24 }
 0x226   :  { %v717_v54 = vand.u32 2147483647, %v701_v7  ;;  %1091 = vlog2.f32 %v743_v55  ;;  %vm1546_vm0 = vcmp.lt.f32.partialorder %v767_v25, 0.0004427343  ;;  %v776_v44 = vand.u32 2147483647, %v1523_v59 }
 0x227   :  { %v718_v56 = vand.u32 2147483647, %v702_v51  ;;  %v709_v45 = vmax.f32 %v1509_v49, 0.0  ;;  %v774_v7 = vadd.f32 1.0, %v773_v28 }
 0x228   :  { %v725_v38 = vsub.f32 0.0, %v717_v54  ;;  %vm1564_vm6 = vcmp.lt.f32.partialorder %v776_v44, 0.0004427343 }
 0x229   :  { %v726_v52 = vsub.f32 0.0, %v718_v56 }
 0x22a   :  { %v1525_v63 = vpop.eup %1087  ;;  %v739_v20 = vmul.f32 1.442695, %v725_v38  ;;  %v766_v38 = vmul.f32 %v1521_v34, %v765_v37 }
 0x22b   :  { %v1528_v2 = vpop.eup %1089  ;;  %v741_v3 = vmul.f32 1.442695, %v726_v52  ;;  %v779_v5 = vadd.f32 1.0, %v1525_v63  ;;  %v782_v57 = vmul.f32 -0.5, %v1525_v63  ;;  %v785_v46 = vand.u32 2147483647, %v1525_v63 }
 0x22c   :  { %1093 = vpow2.f32 %v739_v20  ;;  %v788_v50 = vadd.f32 1.0, %v1528_v2  ;;  %v1092_v21 = vpop.eup %1091  ;;  %v791_v58 = vmul.f32 -0.5, %v1528_v2  ;;  %v794_v32 = vand.u32 2147483647, %v1528_v2 }
 0x22d   :  { %1095 = vpow2.f32 %v741_v3  ;;  %v783_v42 = vadd.f32 1.0, %v782_v57  ;;  %v745_v17 = vmul.f32 0.6931472, %v1092_v21  ;;  %vm1568_vm7 = vcmp.lt.f32.partialorder %v785_v46, 0.0004427343  ;;  %v832_v46 = vld [vmem:[#allocation2 + $0x80] sm:$0xff] }
 0x22e   :  { %1097 = vlog2.f32 %v752_v1  ;;  %v792_v47 = vadd.f32 1.0, %v791_v58  ;;  %vm1573_vm8 = vcmp.lt.f32.partialorder %v794_v32, 0.0004427343  ;;  %v775_v21 = vmul.f32 %v1523_v59, %v774_v7 }
 0x22f   :  { %1099 = vlog2.f32 %v779_v5  ;;  %v784_v20 = vmul.f32 %v1525_v63, %v783_v42  ;;  %v928_v32 = vlaneseq }
 0x230   :  { %1101 = vlog2.f32 %v788_v50  ;;  %v793_v50 = vmul.f32 %v1528_v2, %v792_v47 }
 0x231   :  { %1103 = vlog2.f32 %v761_v8  ;;  %vm930_vm13 = vcmp.lt.s32.totalorder %v928_v32, 256 }
 0x232   :  { %v1094_v22 = vpop.eup %1093  ;;  %1105 = vlog2.f32 %v770_v9 }
 0x233   :  { %v1096_v29 = vpop.eup %1095  ;;  %v797_v30 = vadd.f32 1.0, %v1094_v22  ;;  %v800_v16 = vmul.f32 -0.5, %v1094_v22  ;;  %v803_v56 = vand.u32 2147483647, %v1094_v22 }
 0x234   :  { %v1098_v13 = vpop.eup %1097  ;;  %v806_v27 = vadd.f32 1.0, %v1096_v29  ;;  %v809_v19 = vmul.f32 -0.5, %v1096_v29  ;;  %v812_v52 = vand.u32 2147483647, %v1096_v29 }
 0x235   :  { %v1100_v41 = vpop.eup %1099  ;;  %1107 = vlog2.f32 %v797_v30  ;;  %v801_v60 = vadd.f32 1.0, %v800_v16  ;;  %v754_v51 = vmul.f32 0.6931472, %v1098_v13  ;;  %vm804_vm9 = vcmp.lt.f32.partialorder %v803_v56, 0.0004427343 }
 0x236   :  { %v1102_v40 = vpop.eup %1101  ;;  %1109 = vlog2.f32 %v806_v27  ;;  %v781_v6 = vmul.f32 0.6931472, %v1100_v41  ;;  %v810_v49 = vadd.f32 1.0, %v809_v19  ;;  %vm813_vm11 = vcmp.lt.f32.partialorder %v812_v52, 0.0004427343 }
 0x237   :  { %v1104_v36 = vpop.eup %1103  ;;  %v790_v55 = vmul.f32 0.6931472, %v1102_v40  ;;  %v802_v63 = vmul.f32 %v1094_v22, %v801_v60  ;;  %v757_v30 = vmul.f32 %v1518_v31, %v756_v4  ;;  %v751_v27 = vsel %vm1554_vm4, %v1542_v33, %v745_v17 }
 0x238   :  { %v1106_v15 = vpop.eup %1105  ;;  %v763_v1 = vmul.f32 0.6931472, %v1104_v36  ;;  %v787_v62 = vsel %vm1568_vm7, %v784_v20, %v781_v6  ;;  %v811_v25 = vmul.f32 %v1096_v29, %v810_v49  ;;  %v710_v29 = vmax.f32 %v1512_v18, 0.0 }
 0x239   :  { %v772_v34 = vmul.f32 0.6931472, %v1106_v15  ;;  %v796_v57 = vsel %vm1573_vm8, %v793_v50, %v790_v55  ;;  %v819_v23 = vmul.f32 %v787_v62, %v1270_v26  ;;  %v707_v31 = vmax.f32 %v1502_v35, 0.0 }
 0x23a   :  { %v769_v12 = vsel %vm1546_vm0, %v766_v38, %v763_v1  ;;  %v820_v16 = vmul.f32 %v796_v57, %v1270_v26  ;;  %v760_v41 = vsel %vm1558_vm5, %v757_v30, %v754_v51  ;;  %v708_v19 = vmax.f32 %v1504_v39, 0.0 }
 0x23b   :  { %v1108_v5 = vpop.eup %1107  ;;  %v778_v59 = vsel %vm1564_vm6, %v775_v21, %v772_v34  ;;  %v817_v4 = vmul.f32 %v769_v12, %v1270_v26  ;;  %v827_v40 = vadd.f32 %v819_v23, %v707_v31  ;;  %v815_v42 = vmul.f32 %v751_v27, %v1270_v26 }
 0x23c   :  { %v1110_v9 = vpop.eup %1109  ;;  %v799_v14 = vmul.f32 0.6931472, %v1108_v5  ;;  %v818_v18 = vmul.f32 %v778_v59, %v1270_v26  ;;  %v706_v33 = vmax.f32 %v1498_v11, 0.0  ;;  %v828_v35 = vadd.f32 %v820_v16, %v708_v19 }
 0x23d   :  { %v808_v24 = vmul.f32 0.6931472, %v1110_v9  ;;  %v816_v44 = vmul.f32 %v760_v41, %v1270_v26  ;;  %v703_v17 = vmax.f32 %v1490_v43, 0.0  ;;  %v825_v36 = vadd.f32 %v817_v4, %v705_v53  ;;  %v834_v43 = vld [vmem:[#allocation2 + $0x90] sm:$0xff] }
 0x23e   :  { %v805_v2 = vsel %vm804_vm9, %v802_v63, %v799_v14  ;;  %v704_v39 = vmax.f32 %v1492_v0, 0.0  ;;  %v835_v0 = vld [vmem:[#allocation2 + $0x98] sm:$0xff] }
 0x23f   :  { %v821_v22 = vmul.f32 %v805_v2, %v1270_v26  ;;  %v814_v58 = vsel %vm813_vm11, %v811_v25, %v808_v24  ;;  %v823_v10 = vadd.f32 %v815_v42, %v703_v17 }
 0x240   :  { %v822_v13 = vmul.f32 %v814_v58, %v1270_v26  ;;  %v824_v47 = vadd.f32 %v816_v44, %v704_v39  ;;  %v833_v26 = vld [vmem:[#allocation2 + $0x88] sm:$0xff] }
 0x241   :  { %v829_v28 = vadd.f32 %v821_v22, %v709_v45  ;;  %v826_v45 = vadd.f32 %v818_v18, %v706_v33 }
 0x242   :  { %v830_v37 = vadd.f32 %v822_v13, %v710_v29 }
 0x243   :  { %882 = vmatpush.msra.mxu0 %v829_v28 }
 0x244   :  { %908 = vmatpush.msra.mxu1 %v830_v37 }
 0x245   :  { %883 = vmatpush.msra.mxu0 %v827_v40 }
 0x246   :  { %909 = vmatpush.msra.mxu1 %v828_v35 }
 0x247   :  { %884 = vmatpush.msra.mxu0 %v825_v36 }
 0x248   :  { %910 = vmatpush.msra.mxu1 %v826_v45 }
 0x249   :  { %885 = vmatpush.msra.mxu0 %v823_v10 }
 0x24a   :  { %911 = vmatpush.msra.mxu1 %v824_v47  ;;  %994 = vmatmul.msk.f32.vlgmr.msra.gmra.mxu0 %vm305_vm10, %v832_v46 }
 0x24b   :  { %998 = vmatmul.msk.f32.vlgmr.msra.gmra.mxu1 %vm305_vm10, %v832_v46 }
 0x252   :  { %995 = vmatmul.msk.f32.gmra.mxu0 %vm305_vm10, %v833_v26 }
 0x253   :  { %999 = vmatmul.msk.f32.gmra.mxu1 %vm305_vm10, %v833_v26 }
 0x25a   :  { %996 = vmatmul.msk.f32.gmra.mxu0 %vm305_vm10, %v834_v43 }
 0x25b   :  { %1000 = vmatmul.msk.f32.gmra.mxu1 %vm305_vm10, %v834_v43 }
 0x262   :  { %997 = vmatmul.msk.f32.gmra.mxu0 %vm305_vm10, %v835_v0 }
 0x263   :  { %1001 = vmatmul.msk.f32.gmra.mxu1 %vm305_vm10, %v835_v0 }
 0x2c7   :  { %v887_v11 = vpop.f32.mrf.mxu0 }
 0x2c8   :  { %v913_v15 = vpop.f32.mrf.mxu1  ;;  %v888_v6 = vadd.f32 %v887_v11, %v844_v48 }
 0x2c9   :  { %v914_v60 = vadd.f32 %v913_v15, %v844_v48 }
 0x2cb   :  { %v924_v7 = vrot.slane %v914_v60, 7 }
 0x2cd   :  { %v926_v51 = vsel %vm925_vm12, %v888_v6, %v924_v7 }
 0x2ce   :  { %932 = vst.msk [vmem:[#allocation5] sm:$0x3] %vm930_vm13, %v926_v51 }
 0x2cf   :  { %v890_v54 = vpop.f32.mrf.mxu0  ;;  %943 = dma.vmem_to_hbm [thread:$0]  %s939_s20, 32, %s941_s1, [#allocation4]  }
 0x2d0   :  { %v916_v56 = vpop.f32.mrf.mxu1 }
 0x2d7   :  { %v892_v49 = vpop.f32.mrf.mxu0 }
 0x2d8   :  { %v918_v55 = vpop.f32.mrf.mxu1 }
 0x2df   :  { %v894_v38 = vpop.f32.mrf.mxu0 }
 0x2e0   :  { %v920_v52 = vpop.f32.mrf.mxu1 }
 0x2e1   :  { %1161 = dma.done.wait [#allocation4], 32  }
 0x2e2   :  { %1162 = vsyncadd [#allocation4], 4294967264 }
 0x2e3   :  { %948 = vsyncpa [#allocation3], 1 }
 0x2e4   :  { %949 = vsyncpa [#allocation4], 1 }

</bundles_post_ra>
